<compile_context>
chip_gen: v7x
topology: tpu7x:2x2x1
jax: 0.10.0
libtpu: 0.0.40
codegen_flags: <defaults>
</compile_context>

<pallas_src>
import functools

import jax
import jax.numpy as jnp
from jax.experimental import pallas as pl
from jax.experimental.pallas import tpu as pltpu

P_SEESAW = 0.8
EPS = 1.0e-6


def _combined_loss_kernel(logits_ref, targets_ref, counts_ref, out_ref,
                          *, batch_size_param):
    logits = logits_ref[...].astype(jnp.float32)              # (B, C)
    B, C = logits.shape
    tgt = targets_ref[...]                                     # (B, 1) int32
    counts = counts_ref[...]                                   # (1, C) float32

    # one-hot(targets) via 2-D iota (TPU requires >=2D iota)
    iota = jax.lax.broadcasted_iota(jnp.int32, (B, C), 1)
    onehot = (iota == tgt).astype(jnp.float32)                 # (B, C)

    # numerically-stable exp — the only (B, C) transcendental in the kernel
    m = jnp.max(logits, axis=-1, keepdims=True)                # (B, 1)
    ez = jnp.exp(logits - m)                                   # (B, C)

    # counts**p once per class (C transcendentals), not per (B, C) element.
    # counts are assumed strictly > 0 (matches the reference); a zero count
    # would give log(0) = -inf -> cp = 0, which still yields the correct
    # selected value through the where() below.
    cp = jnp.exp(P_SEESAW * jnp.log(counts))                   # (1, C) = counts**p

    # per-sample gathers via one-hot (tiny B*C VPU work)
    c_t = jnp.sum(onehot * counts, axis=-1, keepdims=True)     # (B, 1) counts[t_b]
    ctp = jnp.sum(onehot * cp, axis=-1, keepdims=True)         # (B, 1) counts[t_b]**p
    ez_t = jnp.sum(onehot * ez, axis=-1, keepdims=True)        # (B, 1) ez[b, t_b]

    # Seesaw mitigation row for each sample's target class:
    #   s[t_b, j] = cp[j] / ctp[b]  if counts[t_b] > counts[j] else 1
    inv_ctp = pl.reciprocal(ctp, approx=True)                  # (B, 1), EUP slot
    s_row = jnp.where(c_t > counts, cp * inv_ctp, 1.0)         # (B, C), pure VPU

    # denom_t[b] = sum_j (1-onehot)*s[t,j]*ez + ez_t  ==  sum_j s[t,j]*ez  (s[t,t]=1)
    denom_t = jnp.sum(s_row * ez, axis=-1, keepdims=True)      # (B, 1)
    sigma_t = ez_t * pl.reciprocal(denom_t + EPS, approx=True) # (B, 1), EUP slot

    # class boost folded with the 1/B of the batch mean into a single scale
    # applied once after the log-sum:
    #   scale = class_total * batch_size_param / (batch_total * B)
    class_total = jnp.sum(counts)
    batch_total = jnp.sum(c_t)
    scale = (class_total * jnp.float32(batch_size_param)
             / (batch_total * jnp.float32(B)))                 # one scalar divide

    out_ref[0, 0] = -jnp.sum(jnp.log(sigma_t + EPS)) * scale


def combined_loss(logits, targets, class_counts, *, batch_size_param):
    """logits: (B, C) float (native dtype); targets: (B,) int; class_counts: (C,)."""
    B, C = logits.shape
    targets2d = targets.astype(jnp.int32).reshape(B, 1)
    counts2d = class_counts.astype(jnp.float32).reshape(1, C)

    kernel = functools.partial(_combined_loss_kernel,
                               batch_size_param=float(batch_size_param))

    bytes_accessed = (logits.size * logits.dtype.itemsize
                      + targets2d.size * 4 + counts2d.size * 4 + 4)
    out = pl.pallas_call(
        kernel,
        # No grid: whole arrays as single VMEM-resident blocks (avoids the
        # 1-step pipeline prologue/epilogue of a trivial grid).
        in_specs=[
            pl.BlockSpec(memory_space=pltpu.MemorySpace.VMEM),  # logits (native dtype)
            pl.BlockSpec(memory_space=pltpu.MemorySpace.VMEM),  # targets (B,1) int32
            pl.BlockSpec(memory_space=pltpu.MemorySpace.VMEM),  # counts  (1,C) f32
        ],
        # Scalar result lives in SMEM: cheaper than a masked (1,1) VMEM store.
        out_specs=pl.BlockSpec(memory_space=pltpu.MemorySpace.SMEM),
        out_shape=jax.ShapeDtypeStruct((1, 1), jnp.float32),
        cost_estimate=pl.CostEstimate(
            flops=10 * B * C,
            # exp: B*C, counts**p: ~2*C, reciprocals + log: ~3*B
            transcendentals=B * C + 3 * B + 2 * C,
            bytes_accessed=bytes_accessed,
        ),
    )(logits, targets2d, counts2d)
    return out[0, 0]


def _reference(logits, targets, class_counts, *, batch_size_param):
    """Pure-JAX reference mirroring the PyTorch forward (full (C,C) formulation)."""
    counts = class_counts.astype(jnp.float32)
    C = counts.shape[0]
    cond = counts[:, None] > counts[None, :]
    s = jnp.where(cond, (counts[None, :] / counts[:, None]) ** P_SEESAW, 1.0)
    onehot = jax.nn.one_hot(targets, C, dtype=jnp.float32)
    z = logits.astype(jnp.float32) - jnp.max(logits.astype(jnp.float32),
                                             axis=-1, keepdims=True)
    ez = jnp.exp(z)
    denom = jnp.sum((1.0 - onehot)[:, None, :] * s[None, :, :] * ez[:, None, :],
                    axis=-1) + ez
    sigma = ez / (denom + EPS)
    loss = jnp.mean(-jnp.sum(onehot * jnp.log(sigma + EPS), axis=-1))
    class_total = jnp.sum(counts)
    batch_total = jnp.sum(counts[targets])
    return loss * class_total * batch_size_param / batch_total


if __name__ == "__main__":
    B, C = 8, 16                 # batch=8, num_classes=16
    BATCH_SIZE_PARAM = 8         # CombinedLoss(batch_size=...) constructor arg

    key = jax.random.PRNGKey(0)
    k_logits, k_targets, k_counts = jax.random.split(key, 3)
    logits = jax.random.normal(k_logits, (B, C), dtype=jnp.float32)
    targets = jax.random.randint(k_targets, (B,), 0, C, dtype=jnp.int32)
    # per-class sample counts (class_df / class_count), deterministic, > 0
    class_counts = jax.random.randint(k_counts, (C,), 5, 500,
                                      dtype=jnp.int32).astype(jnp.float32)

    out = combined_loss(logits, targets, class_counts,
                        batch_size_param=BATCH_SIZE_PARAM)
    out = jax.block_until_ready(out)

    ref = _reference(logits, targets, class_counts,
                     batch_size_param=BATCH_SIZE_PARAM)
    # Tolerance accounts for pl.reciprocal(approx=True) on the EUP (relative
    # error ~1e-4 per reciprocal) and exp(p*log x) vs direct pow ULP diffs.
    assert jnp.allclose(out, ref, rtol=2e-3, atol=2e-3), (out, ref)

    print("KERNEL_OK")
</pallas_src>

<mosaic_0001>
module attributes {stable_mosaic.version = 11 : i64} {
  func.func @_combined_loss_kernel(%arg0: memref<8x16xf32, #tpu.memory_space<vmem>>, %arg1: memref<8x1xi32, #tpu.memory_space<vmem>>, %arg2: memref<1x16xf32, #tpu.memory_space<vmem>>, %arg3: memref<1x1xf32, #tpu.memory_space<smem>>) attributes {dimension_semantics = [], scalar_prefetch = 0 : i64, scratch_operands = 0 : i64, tpu.core_type = #tpu.core_type<tc>} {
    %c0 = arith.constant 0 : index
    %c0_0 = arith.constant 0 : index
    %0 = vector.load %arg0[%c0, %c0_0] : memref<8x16xf32, #tpu.memory_space<vmem>>, vector<8x16xf32>
    %c0_1 = arith.constant 0 : index
    %c0_2 = arith.constant 0 : index
    %1 = vector.load %arg1[%c0_1, %c0_2] : memref<8x1xi32, #tpu.memory_space<vmem>>, vector<8x1xi32>
    %c0_3 = arith.constant 0 : index
    %c0_4 = arith.constant 0 : index
    %2 = vector.load %arg2[%c0_3, %c0_4] : memref<1x16xf32, #tpu.memory_space<vmem>>, vector<1x16xf32>
    %3 = tpu.iota {dimensions = array<i32: 1>} : vector<8x16xi32>
    %4 = vector.broadcast %1 : vector<8x1xi32> to vector<8x16xi32>
    %5 = arith.cmpi eq, %3, %4 : vector<8x16xi32>
    %6 = arith.extui %5 : vector<8x16xi1> to vector<8x16xi32>
    %7 = arith.sitofp %6 : vector<8x16xi32> to vector<8x16xf32>
    %cst = arith.constant dense<0xFF800000> : vector<8xf32>
    %8 = vector.multi_reduction <maximumf>, %0, %cst [1] : vector<8x16xf32> to vector<8xf32>
    %9 = vector.shape_cast %8 : vector<8xf32> to vector<8x1xf32>
    %10 = vector.broadcast %9 : vector<8x1xf32> to vector<8x16xf32>
    %11 = arith.subf %0, %10 : vector<8x16xf32>
    %12 = math.exp %11 : vector<8x16xf32>
    %13 = math.log %2 : vector<1x16xf32>
    %cst_5 = arith.constant 8.000000e-01 : f32
    %14 = vector.broadcast %cst_5 : f32 to vector<1x16xf32>
    %15 = arith.mulf %14, %13 : vector<1x16xf32>
    %16 = math.exp %15 : vector<1x16xf32>
    %17 = vector.broadcast %2 : vector<1x16xf32> to vector<8x16xf32>
    %18 = arith.mulf %7, %17 : vector<8x16xf32>
    %cst_6 = arith.constant dense<0.000000e+00> : vector<8xf32>
    %19 = vector.multi_reduction <add>, %18, %cst_6 [1] : vector<8x16xf32> to vector<8xf32>
    %20 = vector.shape_cast %19 : vector<8xf32> to vector<8x1xf32>
    %21 = vector.broadcast %16 : vector<1x16xf32> to vector<8x16xf32>
    %22 = arith.mulf %7, %21 : vector<8x16xf32>
    %cst_7 = arith.constant dense<0.000000e+00> : vector<8xf32>
    %23 = vector.multi_reduction <add>, %22, %cst_7 [1] : vector<8x16xf32> to vector<8xf32>
    %24 = vector.shape_cast %23 : vector<8xf32> to vector<8x1xf32>
    %25 = arith.mulf %7, %12 : vector<8x16xf32>
    %cst_8 = arith.constant dense<0.000000e+00> : vector<8xf32>
    %26 = vector.multi_reduction <add>, %25, %cst_8 [1] : vector<8x16xf32> to vector<8xf32>
    %27 = vector.shape_cast %26 : vector<8xf32> to vector<8x1xf32>
    %28 = tpu.reciprocal %24 {approx = true} : vector<8x1xf32> -> vector<8x1xf32>
    %29 = vector.broadcast %20 : vector<8x1xf32> to vector<8x16xf32>
    %30 = vector.broadcast %2 : vector<1x16xf32> to vector<8x16xf32>
    %31 = arith.cmpf ogt, %29, %30 : vector<8x16xf32>
    %32 = vector.broadcast %16 : vector<1x16xf32> to vector<8x16xf32>
    %33 = vector.broadcast %28 : vector<8x1xf32> to vector<8x16xf32>
    %34 = arith.mulf %32, %33 : vector<8x16xf32>
    %cst_9 = arith.constant 1.000000e+00 : f32
    %35 = vector.broadcast %cst_9 : f32 to vector<8x16xf32>
    %36 = arith.select %31, %34, %35 : vector<8x16xi1>, vector<8x16xf32>
    %37 = arith.mulf %36, %12 : vector<8x16xf32>
    %cst_10 = arith.constant dense<0.000000e+00> : vector<8xf32>
    %38 = vector.multi_reduction <add>, %37, %cst_10 [1] : vector<8x16xf32> to vector<8xf32>
    %39 = vector.shape_cast %38 : vector<8xf32> to vector<8x1xf32>
    %cst_11 = arith.constant 9.99999997E-7 : f32
    %40 = vector.broadcast %cst_11 : f32 to vector<8x1xf32>
    %41 = arith.addf %39, %40 : vector<8x1xf32>
    %42 = tpu.reciprocal %41 {approx = true} : vector<8x1xf32> -> vector<8x1xf32>
    %43 = arith.mulf %27, %42 : vector<8x1xf32>
    %44 = vector.shape_cast %2 : vector<1x16xf32> to vector<1x1x16xf32>
    %cst_12 = arith.constant dense<0.000000e+00> : vector<1xf32>
    %45 = vector.multi_reduction <add>, %44, %cst_12 [1, 2] : vector<1x1x16xf32> to vector<1xf32>
    %46 = vector.shape_cast %45 : vector<1xf32> to vector<1x1x1xf32>
    %47 = vector.extract %46[0, 0, 0] : f32 from vector<1x1x1xf32>
    %48 = vector.shape_cast %20 : vector<8x1xf32> to vector<1x8x1xf32>
    %cst_13 = arith.constant dense<0.000000e+00> : vector<1xf32>
    %49 = vector.multi_reduction <add>, %48, %cst_13 [1, 2] : vector<1x8x1xf32> to vector<1xf32>
    %50 = vector.shape_cast %49 : vector<1xf32> to vector<1x1x1xf32>
    %51 = vector.extract %50[0, 0, 0] : f32 from vector<1x1x1xf32>
    %cst_14 = arith.constant 8.000000e+00 : f32
    %52 = arith.mulf %47, %cst_14 : f32
    %cst_15 = arith.constant 8.000000e+00 : f32
    %53 = arith.mulf %51, %cst_15 : f32
    %54 = arith.divf %52, %53 : f32
    %cst_16 = arith.constant 9.99999997E-7 : f32
    %55 = vector.broadcast %cst_16 : f32 to vector<8x1xf32>
    %56 = arith.addf %43, %55 : vector<8x1xf32>
    %57 = math.log %56 : vector<8x1xf32>
    %58 = vector.shape_cast %57 : vector<8x1xf32> to vector<1x8x1xf32>
    %cst_17 = arith.constant dense<0.000000e+00> : vector<1xf32>
    %59 = vector.multi_reduction <add>, %58, %cst_17 [1, 2] : vector<1x8x1xf32> to vector<1xf32>
    %60 = vector.shape_cast %59 : vector<1xf32> to vector<1x1x1xf32>
    %61 = vector.extract %60[0, 0, 0] : f32 from vector<1x1x1xf32>
    %cst_18 = arith.constant 0.000000e+00 : f32
    %62 = arith.subf %cst_18, %61 : f32
    %63 = arith.mulf %62, %54 : f32
    %c0_19 = arith.constant 0 : index
    %c0_20 = arith.constant 0 : index
    %64 = memref.load %arg3[%c0_19, %c0_20] : memref<1x1xf32, #tpu.memory_space<smem>>
    memref.store %63, %arg3[%c0_19, %c0_20] : memref<1x1xf32, #tpu.memory_space<smem>>
    return
  }
}

</mosaic_0001>

<bundles_post_ra>
// kernel: tpu_custom_call.1
= control target key start
LH: loop header
LB: loop body
LE: loop exit
PB: predicated region body
PF: predicated region fallthrough
CT: control target
= control target key end

     0   :  { %v170_v1 = vmov 0   ;;  %s221_s0 = inlined_call_operand.vmem [shape: f32[8,16], index: 0, kind: input, shape index: {}]   ;;  %s222_s1 = inlined_call_operand.vmem [shape: s32[8,1], index: 1, kind: input, shape index: {}]   ;;  %s223_s2 = inlined_call_operand.vmem [shape: f32[1,16], index: 2, kind: input, shape index: {}]   ;;  %s224_s3 = inlined_call_operand.hbm [shape: f32[1,1], index: 3, kind: output, shape index: {}]  }
   0x1   :  { %v16_v0 = vld [vmem:[%s222_s1] sm:$0xff]  ;;  %143 = vset.pattern.permute.xlu0 %v170_v1 }
   0x2   :  { %8 = vsyncpa [#allocation3], 0  ;;  %21 = vperm.xlu0 %143, %v16_v0   ;;  %v15_v2 = vld [vmem:[%s221_s0] sm:$0xff]  ;;  %vm26_vm0 = vcmask 130048   ;;  %v18_v9 = vlaneseq  ;;  %v171_v17 = vmov 0.0   ;;  %vm73_vm3 = vcmask 122880  }
   0x3   :  { %v27_v3 = vsel %vm26_vm0, %v15_v2, -inf  ;;  %v17_v4 = vld [vmem:[%s223_s2] sm:$0x1]  ;;  %vm84_vm4 = vcmask 7168   ;;  %s158_s26 = scalar_lea.hbm %s224_s3, 16 }
   0x4   :  { %144 = vlog2.f32 %v17_v4  ;;  %v40_v10 = vshrl.u32 %v18_v9, 7  ;;  %v19_v13 = vand.u32 127, %v18_v9  ;;  %v74_v36 = vsel %vm73_vm3, %v17_v4, 0.0  ;;  %p159_p0 = scmp.ne.s32.totalorder %s224_s3, %s158_s26  ;;  %p162_p1 = scmp.lt.u32.totalorder %s158_s26, %s224_s3 }
   0x6   :  { %v41_v11 = vsub.s32 0, %v40_v10  ;;  %p164_p2 = pnand %p162_p1, %p159_p0 }
   0x8   :  { %v42_v16 = vrot.slane %v17_v4, %v41_v11 }
   0xe   :  { %v145_v5 = vpop.eup %144 }
   0xf   :  { %v34_v6 = vmul.f32 0.6931472, %v145_v5 }
  0x11   :  { %v35_v7 = vmul.f32 0.8, %v34_v6 }
  0x13   :  { %v36_v8 = vmul.f32 1.442695, %v35_v7 }
  0x15   :  { %146 = vpow2.f32 %v36_v8 }
  0x1f   :  { %v147_v12 = vpop.eup %146 }
  0x20   :  { %v52_v14 = vrot.slane %v147_v12, %v41_v11 }
  0x21   :  { %28 = vmax.xlane.f32.xlu0 %v27_v3 }
  0x81   :  { %v22_v15 = vpop.permute.xlu0 %21 }
  0x82   :  { %vm23_vm1 = vcmp.eq.s32.totalorder %v19_v13, %v22_v15 }
  0x83   :  { %v131_v18 = vsel %vm23_vm1, 1.0, %v171_v17 }
  0x84   :  { %v54_v19 = vmul.f32 %v131_v18, %v52_v14  ;;  %v44_v21 = vmul.f32 %v131_v18, %v42_v16 }
  0x86   :  { %v55_v20 = vsel %vm26_vm0, %v54_v19, 0.0  ;;  %v45_v22 = vsel %vm26_vm0, %v44_v21, 0.0 }
  0x87   :  { %56 = vadd.xlane.f32.xlu1 %v55_v20 }
  0x8b   :  { %46 = vadd.xlane.f32.xlu1 %v45_v22 }
  0xae   :  { %v29_v23 = vpop.xlane.xlu0 %28 }
  0xaf   :  { %v30_v24 = vsub.f32 %v15_v2, %v29_v23 }
  0xb1   :  { %v31_v25 = vmul.f32 1.442695, %v30_v24 }
 0x114   :  { %v57_v26 = vpop.xlane.xlu1 %56 }
 0x115   :  { %148 = vrcp.f32 %v57_v26 }
 0x116   :  { %150 = vpow2.f32 %v31_v25 }
 0x118   :  { %v47_v27 = vpop.xlane.xlu1 %46 }
 0x119   :  { %vm63_vm2 = vcmp.gt.f32.partialorder %v47_v27, %v42_v16  ;;  %v85_v37 = vsel %vm84_vm4, %v47_v27, 0.0 }
 0x11f   :  { %v149_v28 = vpop.eup %148 }
 0x120   :  { %v64_v29 = vmul.f32 %v149_v28, %v52_v14  ;;  %v151_v30 = vpop.eup %150 }
 0x121   :  { %v58_v34 = vmul.f32 %v151_v30, %v131_v18 }
 0x122   :  { %v65_v31 = vsel %vm63_vm2, %v64_v29, 1.0 }
 0x123   :  { %v66_v32 = vmul.f32 %v151_v30, %v65_v31  ;;  %v59_v35 = vsel %vm26_vm0, %v58_v34, 0.0 }
 0x125   :  { %v67_v33 = vsel %vm26_vm0, %v66_v32, 0.0 }
 0x126   :  { %68 = vadd.xlane.f32.xlu1 %v67_v33 }
 0x12a   :  { %60 = vadd.xlane.f32.xlu1 %v59_v35 }
 0x12e   :  { %75 = vadd.xlane.f32.xlu1 %v74_v36 }
 0x132   :  { %86 = vadd.xlane.f32.xlu1 %v85_v37 }
 0x1b3   :  { %v69_v38 = vpop.xlane.xlu1 %68 }
 0x1b4   :  { %v70_v39 = vadd.f32 1e-06, %v69_v38 }
 0x1b6   :  { %152 = vrcp.f32 %v70_v39 }
 0x1b7   :  { %v61_v40 = vpop.xlane.xlu1 %60 }
 0x1bb   :  { %v76_v41 = vpop.xlane.xlu1 %75 }
 0x1bc   :  { %v77_v42 = vrot.slane %v76_v41, 4 }
 0x1be   :  { %v78_v43 = vadd.f32 %v77_v42, %v76_v41 }
 0x1bf   :  { %v87_v44 = vpop.xlane.xlu1 %86 }
 0x1c0   :  { %v153_v45 = vpop.eup %152  ;;  %v79_v46 = vrot.slane %v78_v43, 2  ;;  %v88_v47 = vrot.slane %v87_v44, 4 }
 0x1c1   :  { %v72_v48 = vmul.f32 %v153_v45, %v61_v40 }
 0x1c2   :  { %v89_v49 = vadd.f32 %v88_v47, %v87_v44  ;;  %v80_v50 = vadd.f32 %v79_v46, %v78_v43 }
 0x1c3   :  { %v101_v51 = vadd.f32 1e-06, %v72_v48 }
 0x1c4   :  { %v90_v52 = vrot.slane %v89_v49, 2  ;;  %v81_v53 = vrot.slane %v80_v50, 1 }
 0x1c5   :  { %154 = vlog2.f32 %v101_v51 }
 0x1c6   :  { %v82_v54 = vadd.f32 %v81_v53, %v80_v50  ;;  %v91_v55 = vadd.f32 %v90_v52, %v89_v49 }
 0x1c8   :  { %132 = vpush %v82_v54  ;;  %v92_v56 = vrot.slane %v91_v55, 1 }
 0x1ca   :  { %v93_v57 = vadd.f32 %v92_v56, %v91_v55 }
 0x1cc   :  { %134 = vpush %v93_v57 }
 0x1cf   :  { %v155_v58 = vpop.eup %154 }
 0x1d0   :  { %v103_v59 = vmul.f32 0.6931472, %v155_v58 }
 0x1d2   :  { %v104_v60 = vsel %vm84_vm4, %v103_v59, 0.0 }
 0x1d3   :  { %105 = vadd.xlane.f32.xlu1 %v104_v60 }
 0x1f9   :  { %s133_s0 = spop %132 }
 0x1fa   :  { %s95_s18 = smul.f32 8.0, %s133_s0 }
 0x1fd   :  { %s135_s1 = spop %134 }
 0x1fe   :  { %s96_s2 = smul.f32 8.0, %s135_s1 }
 0x200   :  { %v97_v61 = vstv %s96_s2 }
 0x201   :  { %156 = vrcp.f32 %v97_v61 }
 0x20b   :  { %v157_v62 = vpop.eup %156 }
 0x20c   :  { %136 = vpush %v157_v62 }
 0x23d   :  { %s137_s19 = spop %136 }
 0x23e   :  { %s100_s21 = smul.f32 %s137_s19, %s95_s18 }
 0x260   :  { %v106_v63 = vpop.xlane.xlu1 %105 }
 0x261   :  { %v107_v0 = vrot.slane %v106_v63, 4 }
 0x263   :  { %v108_v1 = vadd.f32 %v107_v0, %v106_v63 }
 0x265   :  { %v109_v2 = vrot.slane %v108_v1, 2 }
 0x267   :  { %v110_v3 = vadd.f32 %v109_v2, %v108_v1 }
 0x269   :  { %v111_v4 = vrot.slane %v110_v3, 1 }
 0x26b   :  { %v112_v5 = vadd.f32 %v111_v4, %v110_v3 }
 0x26d   :  { %138 = vpush %v112_v5 }
 0x29e   :  { %s139_s20 = spop %138 }
 0x29f   :  { %s114_s22 = ssub.f32 0.0, %s139_s20 }
 0x2a1   :  { %s115_s23 = smul.f32 %s114_s22, %s100_s21 }
 0x2a3   :  { %117 = sst [smem:[#allocation2]] %s115_s23 }
 0x2a4   :  { %167 = shalt.err (!%p164_p2)
}
 0x2a5   :  { %s172_s4 = smov [#allocation2]  }
 0x2a6   :  { %125 = dma.smem_to_hbm %s172_s4, 16, %s224_s3, [#allocation3]  }
 0x2a7   :  { %168 = dma.done.wait [#allocation3], 16  }
 0x2a8   :  { %169 = vsyncadd [#allocation3], 4294967280 }
 0x2a9   :  { %129 = sfence }
 0x2aa   :  { %130 = vsyncpa [#allocation3], 1 }

</bundles_post_ra>
